<compile_context>
chip_gen: v7x
topology: tpu7x:2x2x1
jax: 0.10.0
libtpu: 0.0.40
codegen_flags: <defaults>
</compile_context>

<pallas_src>
import functools
import math

import jax
import jax.numpy as jnp
from jax import lax
from jax.experimental import pallas as pl
from jax.experimental.pallas import tpu as pltpu


# ---------------------------------------------------------------------------
# Kernel bodies
# ---------------------------------------------------------------------------

def _sdpa_body(q_ref, k_ref, v_ref, o_ref, s_ref, *, scale, bf16_matmul):
    """One (batch, query-tile) step with the full key extent resident.

    q_ref: (TQ, D)   k_ref: (Sk, D)   v_ref: (Sk, Dv)
    o_ref: (TQ, Dv)  s_ref: (TQ, Sk) or None
    """
    q = q_ref[...]
    k = k_ref[...]
    v = v_ref[...]

    # Fold 1/sqrt(d_k) into q (Sq*D work instead of Sq*Sk on the logits).
    q = q * jnp.asarray(scale, dtype=q.dtype)

    if bf16_matmul and q.dtype == jnp.float32:
        q_mm, k_mm = q.astype(jnp.bfloat16), k.astype(jnp.bfloat16)
    else:
        q_mm, k_mm = q, k

    # logits = q @ k^T via a trans_b-style contraction (no XLU relayout of k),
    # f32 accumulation on the MXU.
    logits = lax.dot_general(
        q_mm, k_mm,
        dimension_numbers=(((1,), (1,)), ((), ())),
        preferred_element_type=jnp.float32,
    )  # (TQ, Sk) f32

    # Numerically stable softmax along the last axis (f32 math, EUP reciprocal).
    m = jnp.max(logits, axis=-1, keepdims=True)
    e = jnp.exp(logits - m)
    denom = jnp.sum(e, axis=-1, keepdims=True)
    inv = pl.reciprocal(denom, approx=True)  # (TQ, 1) f32

    mm_dtype = jnp.bfloat16 if (bf16_matmul and v.dtype == jnp.float32) else v.dtype
    v_mm = v if v.dtype == mm_dtype else v.astype(mm_dtype)

    if s_ref is None:
        # Deferred normalization: (e @ v) * inv costs TQ*Dv multiplies instead
        # of TQ*Sk for p = e * inv — a direct VALU-slot win for small head dims.
        out = jnp.dot(e.astype(mm_dtype), v_mm, preferred_element_type=jnp.float32)
        out = out * inv
    else:
        p = e * inv  # (TQ, Sk) f32 probabilities
        if jnp.dtype(s_ref.dtype) == jnp.dtype(mm_dtype):
            # Single cast reused for both the MXU operand and the scores store.
            p_cast = p.astype(mm_dtype)
            s_ref[...] = p_cast
            out = jnp.dot(p_cast, v_mm, preferred_element_type=jnp.float32)
        else:
            s_ref[...] = p.astype(s_ref.dtype)
            out = jnp.dot(p.astype(mm_dtype), v_mm, preferred_element_type=jnp.float32)

    o_ref[...] = out.astype(o_ref.dtype)


def _sdpa_flash_body(q_ref, k_ref, v_ref, o_ref, m_sc, l_sc, acc_sc, *,
                     scale, bf16_matmul):
    """One (batch, query-tile, key-tile) step of the online-softmax path.

    q_ref: (TQ, D)  k_ref: (TSK, D)  v_ref: (TSK, Dv)  o_ref: (TQ, Dv)
    m_sc/l_sc: (TQ, 1) f32 scratch, acc_sc: (TQ, Dv) f32 scratch.
    """
    ki = pl.program_id(2)

    @pl.when(ki == 0)
    def _():
        m_sc[...] = jnp.full(m_sc.shape, -jnp.inf, dtype=m_sc.dtype)
        l_sc[...] = jnp.zeros(l_sc.shape, dtype=l_sc.dtype)
        acc_sc[...] = jnp.zeros(acc_sc.shape, dtype=acc_sc.dtype)

    q = q_ref[...] * jnp.asarray(scale, dtype=q_ref.dtype)
    k = k_ref[...]
    v = v_ref[...]

    if bf16_matmul and q.dtype == jnp.float32:
        q, k = q.astype(jnp.bfloat16), k.astype(jnp.bfloat16)

    s = lax.dot_general(
        q, k,
        dimension_numbers=(((1,), (1,)), ((), ())),
        preferred_element_type=jnp.float32,
    )  # (TQ, TSK) f32

    m_prev = m_sc[...]
    m_new = jnp.maximum(m_prev, jnp.max(s, axis=-1, keepdims=True))
    alpha = jnp.exp(m_prev - m_new)
    e = jnp.exp(s - m_new)

    mm_dtype = jnp.bfloat16 if (bf16_matmul and v.dtype == jnp.float32) else v.dtype
    pv = jnp.dot(e.astype(mm_dtype), v.astype(mm_dtype),
                 preferred_element_type=jnp.float32)

    l_sc[...] = alpha * l_sc[...] + jnp.sum(e, axis=-1, keepdims=True)
    acc_sc[...] = alpha * acc_sc[...] + pv
    m_sc[...] = m_new

    @pl.when(ki == pl.num_programs(2) - 1)
    def _():
        o_ref[...] = (acc_sc[...] * pl.reciprocal(l_sc[...], approx=True)
                      ).astype(o_ref.dtype)


# ---------------------------------------------------------------------------
# Tiling heuristics
# ---------------------------------------------------------------------------

def _vmem_budget_bytes():
    """Returns (working-set budget, vmem_limit_bytes, is_small_vmem_chip)."""
    try:
        cap = int(pltpu.get_tpu_info().vmem_capacity_bytes)
    except Exception:
        cap = None
    if cap is None:
        # Conservative fallback that is safe on every generation.
        return 24 * 1024 * 1024, 32 * 1024 * 1024, False
    if cap >= 100 * 1024 * 1024:
        # v5e / v6e: 128 MiB physical VMEM — use most of it.
        return 64 * 1024 * 1024, 96 * 1024 * 1024, False
    # v7x-class: 64 MiB per TensorCore.
    return 40 * 1024 * 1024, 56 * 1024 * 1024, True


def _sublane_multiple(dtype):
    """Packed-sublane alignment for the second-to-last tile dim."""
    return {4: 8, 2: 16, 1: 32}.get(jnp.dtype(dtype).itemsize, 8)


_TQ_CANDIDATES = (2048, 1024, 512, 256, 128, 64, 32, 16, 8)
_TSK_CANDIDATES = (1024, 512, 256, 128)


def _choose_tq_full_sk(B, Sq, Sk, D, Dv, itemsize, align, budget, save_scores):
    """Largest query tile whose working set fits the budget. Returns (tq, fits)."""

    def fits(tq):
        kv = 2 * Sk * (D + Dv) * itemsize                   # resident K/V (dbl buffered)
        per_q = 2 * tq * (D + Dv) * itemsize                 # q / out tiles
        sc = 2 * tq * Sk * itemsize if save_scores else 0    # scores tile
        tmp = 2 * tq * Sk * 4                                # f32 logits + exp temps
        return kv + per_q + sc + tmp <= budget

    cands = [c for c in _TQ_CANDIDATES
             if c % align == 0 and c < Sq and Sq % c == 0 and fits(c)]
    # Dual-TC chips (v7x) shard parallel grid axes across cores: with a single
    # batch element prefer >=2 query tiles so both TensorCores get work.
    if B == 1 and cands:
        return cands[0], True
    if fits(Sq):
        return Sq, True
    if cands:
        return cands[0], True
    return Sq, False


def _choose_flash_tiles(Sq, Sk, D, Dv, itemsize, align, budget):
    """(TQ, TSK) for the online-softmax (Sk-tiled) path."""
    tsk = next((c for c in _TSK_CANDIDATES if c < Sk and Sk % c == 0), Sk)

    def fits(tq):
        kv = 2 * tsk * (D + Dv) * itemsize
        per_q = 2 * tq * (D + Dv) * itemsize
        scratch = tq * (Dv + 2) * 4
        tmp = 2 * tq * tsk * 4
        return kv + per_q + scratch + tmp <= budget

    if fits(Sq):
        return Sq, tsk
    cands = [c for c in _TQ_CANDIDATES
             if c % align == 0 and c < Sq and Sq % c == 0 and fits(c)]
    if cands:
        return cands[0], tsk
    return Sq, tsk


# ---------------------------------------------------------------------------
# Public wrapper
# ---------------------------------------------------------------------------

def scaled_dot_attention(q, k, v, d_k=None, save_scores=True,
                         use_bf16_matmul=False, sk_tile=None):
    """Scaled dot-product attention.

    q: (*, Sq, D), k: (*, Sk, D), v: (*, Sk, Dv).
    Returns (outputs, scores) when save_scores=True (SCORE_SAVER analogue),
    else outputs only.
    """
    if d_k is None:
        d_k = q.shape[-1]

    batch_dims = q.shape[:-2]
    Sq, D = q.shape[-2:]
    Sk = k.shape[-2]
    Dv = v.shape[-1]
    B = 1
    for b in batch_dims:
        B *= int(b)
    B = max(B, 1)

    qf = q.reshape(B, Sq, D)
    kf = k.reshape(B, Sk, D)
    vf = v.reshape(B, Sk, Dv)

    itemsize = jnp.dtype(q.dtype).itemsize
    align = _sublane_multiple(q.dtype)
    budget, vmem_limit, small_vmem = _vmem_budget_bytes()
    scale = 1.0 / math.sqrt(float(d_k))

    # Advisory scheduling hint for XLA around the custom call.
    bytes_accessed = (qf.size + kf.size + vf.size + B * Sq * Dv) * itemsize
    if save_scores:
        bytes_accessed += B * Sq * Sk * itemsize
    cost = pl.CostEstimate(
        flops=2 * B * Sq * Sk * (D + Dv),
        transcendentals=B * Sq * Sk,
        bytes_accessed=bytes_accessed,
    )

    TQ, fits_full_sk = _choose_tq_full_sk(
        B, Sq, Sk, D, Dv, itemsize, align, budget, save_scores)
    use_flash = (not save_scores) and (sk_tile is not None or not fits_full_sk)
    # TODO(synk): when save_scores=True and the full-Sk working set overflows the
    # budget, the full scores matrix must be materialized anyway; a two-pass
    # (logits then normalize) variant would be needed for graceful degradation.

    if use_flash:
        if sk_tile is not None:
            TQ, TSK = sk_tile
        else:
            TQ, TSK = _choose_flash_tiles(Sq, Sk, D, Dv, itemsize, align, budget)
        num_q_blocks = Sq // TQ
        num_k_blocks = Sk // TSK

        kernel = functools.partial(_sdpa_flash_body, scale=scale,
                                   bf16_matmul=use_bf16_matmul)
        out = pl.pallas_call(
            kernel,
            out_shape=jax.ShapeDtypeStruct((B, Sq, Dv), q.dtype),
            grid_spec=pltpu.PrefetchScalarGridSpec(
                num_scalar_prefetch=0,
                grid=(B, num_q_blocks, num_k_blocks),
                in_specs=[
                    pl.BlockSpec((pl.Squeezed(), TQ, D), lambda b, qi, ki: (b, qi, 0)),
                    pl.BlockSpec((pl.Squeezed(), TSK, D), lambda b, qi, ki: (b, ki, 0)),
                    pl.BlockSpec((pl.Squeezed(), TSK, Dv), lambda b, qi, ki: (b, ki, 0)),
                ],
                out_specs=pl.BlockSpec((pl.Squeezed(), TQ, Dv),
                                       lambda b, qi, ki: (b, qi, 0)),
                scratch_shapes=[
                    pltpu.VMEM((TQ, 1), jnp.float32),   # running max m
                    pltpu.VMEM((TQ, 1), jnp.float32),   # running denom l
                    pltpu.VMEM((TQ, Dv), jnp.float32),  # running accumulator
                ],
            ),
            compiler_params=pltpu.CompilerParams(
                dimension_semantics=("parallel", "parallel", "arbitrary"),
                vmem_limit_bytes=vmem_limit,
            ),
            cost_estimate=cost,
        )(qf, kf, vf)
        return out.reshape(*batch_dims, Sq, Dv)

    num_q_blocks = Sq // TQ

    # K/V do not depend on the query-tile grid axis; on small-VMEM chips (v7x)
    # drop their second pipeline buffer and spend the bytes on a larger tile.
    kv_pipeline = {}
    if small_vmem and num_q_blocks >= 2:
        kv_pipeline = dict(pipeline_mode=pl.Buffered(1))

    q_spec = pl.BlockSpec((pl.Squeezed(), TQ, D), lambda b, qi: (b, qi, 0))
    k_spec = pl.BlockSpec((pl.Squeezed(), Sk, D), lambda b, qi: (b, 0, 0), **kv_pipeline)
    v_spec = pl.BlockSpec((pl.Squeezed(), Sk, Dv), lambda b, qi: (b, 0, 0), **kv_pipeline)
    o_spec = pl.BlockSpec((pl.Squeezed(), TQ, Dv), lambda b, qi: (b, qi, 0))
    s_spec = pl.BlockSpec((pl.Squeezed(), TQ, Sk), lambda b, qi: (b, qi, 0))
    # TODO(synk): when Dv < 128 the output store is a masked partial vst; folding
    # multiple heads into one call would make the last dim lane-dense.

    if save_scores:
        kernel = functools.partial(_sdpa_body, scale=scale,
                                   bf16_matmul=use_bf16_matmul)
        out_shape = (
            jax.ShapeDtypeStruct((B, Sq, Dv), q.dtype),
            jax.ShapeDtypeStruct((B, Sq, Sk), q.dtype),
        )
        out_specs = [o_spec, s_spec]
    else:
        def kernel(q_ref, k_ref, v_ref, o_ref):
            _sdpa_body(q_ref, k_ref, v_ref, o_ref, None, scale=scale,
                       bf16_matmul=use_bf16_matmul)
        out_shape = jax.ShapeDtypeStruct((B, Sq, Dv), q.dtype)
        out_specs = o_spec

    result = pl.pallas_call(
        kernel,
        out_shape=out_shape,
        grid_spec=pltpu.PrefetchScalarGridSpec(
            num_scalar_prefetch=0,
            grid=(B, num_q_blocks),
            in_specs=[q_spec, k_spec, v_spec],
            out_specs=out_specs,
        ),
        compiler_params=pltpu.CompilerParams(
            dimension_semantics=("parallel", "parallel"),
            vmem_limit_bytes=vmem_limit,
        ),
        cost_estimate=cost,
    )(qf, kf, vf)

    if save_scores:
        out, scores = result
        return (out.reshape(*batch_dims, Sq, Dv),
                scores.reshape(*batch_dims, Sq, Sk))
    return result.reshape(*batch_dims, Sq, Dv)


# ---------------------------------------------------------------------------
# Reference + self-test
# ---------------------------------------------------------------------------

def _reference(q, k, v, d_k):
    logits = jnp.einsum("...qd,...kd->...qk", q, k) / jnp.sqrt(jnp.float32(d_k))
    scores = jax.nn.softmax(logits, axis=-1)
    return jnp.einsum("...qk,...kd->...qd", scores, v), scores


if __name__ == "__main__":
    # Small shapes consistent with the module: batch=2, seq=8, d_model=32.
    B, Sq, Sk, D = 2, 8, 8, 32
    key = jax.random.PRNGKey(0)
    kq, kk, kv = jax.random.split(key, 3)
    q = jax.random.normal(kq, (B, Sq, D), dtype=jnp.float32)
    k = jax.random.normal(kk, (B, Sk, D), dtype=jnp.float32)
    v = jax.random.normal(kv, (B, Sk, D), dtype=jnp.float32)

    ref_out, ref_scores = _reference(q, k, v, D)

    # 1) Default path (scores returned — SCORE_SAVER analogue).
    out, scores = scaled_dot_attention(q, k, v, d_k=D, save_scores=True)
    out = jax.block_until_ready(out)
    scores = jax.block_until_ready(scores)
    # Tolerance accommodates the EUP approximate reciprocal (~2^-12 relative).
    assert jnp.allclose(out, ref_out, atol=2e-3, rtol=2e-3), "output mismatch"
    assert jnp.allclose(scores, ref_scores, atol=2e-3, rtol=2e-3), "scores mismatch"

    # 2) No-scores path (deferred softmax normalization).
    out2 = jax.block_until_ready(
        scaled_dot_attention(q, k, v, d_k=D, save_scores=False))
    assert jnp.allclose(out2, ref_out, atol=2e-3, rtol=2e-3), "no-scores output mismatch"

    # 3) Online-softmax (Sk-tiled) path, forced with small tiles to validate it.
    B2, Sq2, Sk2, D2 = 2, 128, 256, 64
    kq2, kk2, kv2 = jax.random.split(jax.random.PRNGKey(1), 3)
    q2 = jax.random.normal(kq2, (B2, Sq2, D2), dtype=jnp.float32)
    k2 = jax.random.normal(kk2, (B2, Sk2, D2), dtype=jnp.float32)
    v2 = jax.random.normal(kv2, (B2, Sk2, D2), dtype=jnp.float32)
    ref_out2, _ = _reference(q2, k2, v2, D2)
    out3 = jax.block_until_ready(
        scaled_dot_attention(q2, k2, v2, d_k=D2, save_scores=False,
                             sk_tile=(128, 128)))
    assert jnp.allclose(out3, ref_out2, atol=2e-3, rtol=2e-3), "flash output mismatch"

    print("KERNEL_OK")
</pallas_src>

<mosaic_0001>
module attributes {stable_mosaic.version = 11 : i64} {
  func.func @_sdpa_body(%arg0: i32, %arg1: i32, %arg2: memref<1x8x32xf32, #tpu.memory_space<vmem>>, %arg3: memref<1x8x32xf32, #tpu.memory_space<vmem>>, %arg4: memref<1x8x32xf32, #tpu.memory_space<vmem>>, %arg5: memref<1x8x32xf32, #tpu.memory_space<vmem>>, %arg6: memref<1x8x8xf32, #tpu.memory_space<vmem>>) attributes {dimension_semantics = [#tpu.dimension_semantics<parallel>, #tpu.dimension_semantics<parallel>], iteration_bounds = array<i64: 2, 1>, scalar_prefetch = 0 : i64, scratch_operands = 0 : i64, tpu.core_type = #tpu.core_type<tc>, window_params = [{transform_indices = @transform_0, window_bounds = array<i64: 1, 8, 32>}, {transform_indices = @transform_1, window_bounds = array<i64: 1, 8, 32>}, {transform_indices = @transform_2, window_bounds = array<i64: 1, 8, 32>}, {transform_indices = @transform_3, window_bounds = array<i64: 1, 8, 32>}, {transform_indices = @transform_4, window_bounds = array<i64: 1, 8, 8>}]} {
    %c0 = arith.constant 0 : index
    %c0_0 = arith.constant 0 : index
    %c0_1 = arith.constant 0 : index
    %0 = vector.load %arg2[%c0, %c0_0, %c0_1] : memref<1x8x32xf32, #tpu.memory_space<vmem>>, vector<1x8x32xf32>
    %1 = vector.shape_cast %0 : vector<1x8x32xf32> to vector<8x32xf32>
    %c0_2 = arith.constant 0 : index
    %c0_3 = arith.constant 0 : index
    %c0_4 = arith.constant 0 : index
    %2 = vector.load %arg3[%c0_2, %c0_3, %c0_4] : memref<1x8x32xf32, #tpu.memory_space<vmem>>, vector<1x8x32xf32>
    %3 = vector.shape_cast %2 : vector<1x8x32xf32> to vector<8x32xf32>
    %c0_5 = arith.constant 0 : index
    %c0_6 = arith.constant 0 : index
    %c0_7 = arith.constant 0 : index
    %4 = vector.load %arg4[%c0_5, %c0_6, %c0_7] : memref<1x8x32xf32, #tpu.memory_space<vmem>>, vector<1x8x32xf32>
    %5 = vector.shape_cast %4 : vector<1x8x32xf32> to vector<8x32xf32>
    %cst = arith.constant 0.176776692 : f32
    %6 = vector.broadcast %cst : f32 to vector<8x32xf32>
    %7 = arith.mulf %1, %6 : vector<8x32xf32>
    %cst_8 = arith.constant dense<0.000000e+00> : vector<8x8xf32>
    %8 = tpu.matmul %7, %3, %cst_8 {dimension_numbers = #tpu.dot_dimension_numbers<[1], [1], [0], [0], [0, 0, 1, 0], [], []>} : vector<8x32xf32>, vector<8x32xf32>, vector<8x8xf32> -> vector<8x8xf32>
    %cst_9 = arith.constant dense<0xFF800000> : vector<8xf32>
    %9 = vector.multi_reduction <maximumf>, %8, %cst_9 [1] : vector<8x8xf32> to vector<8xf32>
    %10 = vector.shape_cast %9 : vector<8xf32> to vector<8x1xf32>
    %11 = vector.broadcast %10 : vector<8x1xf32> to vector<8x8xf32>
    %12 = arith.subf %8, %11 : vector<8x8xf32>
    %13 = math.exp %12 : vector<8x8xf32>
    %cst_10 = arith.constant dense<0.000000e+00> : vector<8xf32>
    %14 = vector.multi_reduction <add>, %13, %cst_10 [1] : vector<8x8xf32> to vector<8xf32>
    %15 = vector.shape_cast %14 : vector<8xf32> to vector<8x1xf32>
    %16 = tpu.reciprocal %15 {approx = true} : vector<8x1xf32> -> vector<8x1xf32>
    %17 = vector.broadcast %16 : vector<8x1xf32> to vector<8x8xf32>
    %18 = arith.mulf %13, %17 : vector<8x8xf32>
    %c0_11 = arith.constant 0 : index
    %c0_12 = arith.constant 0 : index
    %c0_13 = arith.constant 0 : index
    %19 = vector.load %arg6[%c0_11, %c0_12, %c0_13] : memref<1x8x8xf32, #tpu.memory_space<vmem>>, vector<1x8x8xf32>
    %20 = vector.shape_cast %19 : vector<1x8x8xf32> to vector<8x8xf32>
    %21 = vector.shape_cast %18 : vector<8x8xf32> to vector<1x8x8xf32>
    tpu.vector_store %arg6[%c0_11, %c0_12, %c0_13], %21 {strides = array<i32>} : memref<1x8x8xf32, #tpu.memory_space<vmem>>, vector<1x8x8xf32>,
    %cst_14 = arith.constant dense<0.000000e+00> : vector<8x32xf32>
    %22 = tpu.matmul %18, %5, %cst_14 {dimension_numbers = #tpu.dot_dimension_numbers<[1], [0], [0], [1], [0, 0, 1, 1], [], []>} : vector<8x8xf32>, vector<8x32xf32>, vector<8x32xf32> -> vector<8x32xf32>
    %c0_15 = arith.constant 0 : index
    %c0_16 = arith.constant 0 : index
    %c0_17 = arith.constant 0 : index
    %23 = vector.load %arg5[%c0_15, %c0_16, %c0_17] : memref<1x8x32xf32, #tpu.memory_space<vmem>>, vector<1x8x32xf32>
    %24 = vector.shape_cast %23 : vector<1x8x32xf32> to vector<8x32xf32>
    %25 = vector.shape_cast %22 : vector<8x32xf32> to vector<1x8x32xf32>
    tpu.vector_store %arg5[%c0_15, %c0_16, %c0_17], %25 {strides = array<i32>} : memref<1x8x32xf32, #tpu.memory_space<vmem>>, vector<1x8x32xf32>,
    return
  }
  func.func @transform_0(%arg0: i32, %arg1: i32) -> (i32, i32, i32) {
    %c0_i32 = arith.constant 0 : i32
    %c0_i32_0 = arith.constant 0 : i32
    return %arg0, %arg1, %c0_i32 : i32, i32, i32
  }
  func.func @transform_1(%arg0: i32, %arg1: i32) -> (i32, i32, i32) {
    %c0_i32 = arith.constant 0 : i32
    %c0_i32_0 = arith.constant 0 : i32
    %c0_i32_1 = arith.constant 0 : i32
    return %arg0, %c0_i32, %c0_i32_0 : i32, i32, i32
  }
  func.func @transform_2(%arg0: i32, %arg1: i32) -> (i32, i32, i32) {
    %c0_i32 = arith.constant 0 : i32
    %c0_i32_0 = arith.constant 0 : i32
    %c0_i32_1 = arith.constant 0 : i32
    return %arg0, %c0_i32, %c0_i32_0 : i32, i32, i32
  }
  func.func @transform_3(%arg0: i32, %arg1: i32) -> (i32, i32, i32) {
    %c0_i32 = arith.constant 0 : i32
    %c0_i32_0 = arith.constant 0 : i32
    return %arg0, %arg1, %c0_i32 : i32, i32, i32
  }
  func.func @transform_4(%arg0: i32, %arg1: i32) -> (i32, i32, i32) {
    %c0_i32 = arith.constant 0 : i32
    %c0_i32_0 = arith.constant 0 : i32
    return %arg0, %arg1, %c0_i32 : i32, i32, i32
  }
}

</mosaic_0001>

<bundles_post_ra>
// kernel: tpu_custom_call.1
= control target key start
LH: loop header
LB: loop body
LE: loop exit
PB: predicated region body
PF: predicated region fallthrough
CT: control target
= control target key end

     0   :  { %s1335_s0 = inlined_call_operand.hbm [shape: f32[2,8,32], index: 0, kind: input, shape index: {}]   ;;  %s1336_s1 = inlined_call_operand.hbm [shape: f32[2,8,32], index: 1, kind: input, shape index: {}]   ;;  %s1337_s2 = inlined_call_operand.hbm [shape: f32[2,8,32], index: 2, kind: input, shape index: {}]   ;;  %s1338_s3 = inlined_call_operand.hbm [shape: f32[2,8,32], index: 3, kind: output, shape index: {0}]   ;;  %s1339_s4 = inlined_call_operand.hbm [shape: f32[2,8,8], index: 4, kind: output, shape index: {1}]  }
   0x1   :  { %1348 = sst [smem:[#allocation19_spill]] %s1336_s1 }
   0x2   :  { %10 = vsyncpa [#allocation3], 0 }
   0x3   :  { %12 = vsyncpa [#allocation3 + $0x1], 0 }
   0x4   :  { %13 = vsyncpa [#allocation6], 0 }
   0x5   :  { %15 = vsyncpa [#allocation6 + $0x1], 0 }
   0x6   :  { %16 = vsyncpa [#allocation4], 0 }
   0x7   :  { %18 = vsyncpa [#allocation4 + $0x1], 0 }
   0x8   :  { %19 = vsyncpa [#allocation10], 0 }
   0x9   :  { %21 = vsyncpa [#allocation10 + $0x1], 0  ;;  %s1036_s15 = smov 0   ;;  %s1038_s16 = smov 0  }
   0xa   :  { %s1040_s17 = smov 0   ;;  %s1042_s18 = smov 0  }
   0xb   :  { %s1044_s19 = smov 0   ;;  %s1046_s20 = smov 0  }
   0xc LB: > { %1349 = sst [smem:[#allocation15_spill]] %s998_s19  ;;  %s1067_s21 = sadd.s32 4294967295, %s1002_s20   ;;  %s1002_s20 = sphi %s1046_s20, %s27_s20   ;;  %s998_s19 = sphi %s1044_s19, %s1373_s19   ;;  %s994_s18 = sphi %s1042_s18, %s1372_s18   ;;  %s990_s17 = sphi %s1040_s17, %s1376_s17   ;;  %s986_s16 = sphi %s1038_s16, %s1375_s16   ;;  %s982_s15 = sphi %s1036_s15, %s1374_s15  }
   0xd   : > { %1350 = sst [smem:[#allocation16_spill]] %s1002_s20  ;;  %s673_s22 = sadd.s32 4294967294, %s1002_s20  }
   0xe   : > { %s39_s23 = sadd.s32 1, %s998_s19  ;;  %s48_s24 = sadd.s32 1, %s990_s17 }
   0xf   : > { %p41_p0 = scmp.ge.s32.totalorder %s39_s23, 2  ;;  %p55_p1 = scmp.ne.s32.totalorder %s990_s17, %s986_s16 }
  0x10   : > { %p56_p2 = scmp.eq.s32.totalorder %s1002_s20, 0  ;;  %p61_p3 = scmp.ne.s32.totalorder %s986_s16, %s982_s15 }
  0x11   : > { %s1378_s23 = smov (%p41_p0, %s39_s23), 0  ;;  %p62_p5 = scmp.eq.s32.totalorder %s1067_s21, 0 }
  0x12   : > { %1351 = sst [smem:[#allocation17_spill]] %s1378_s23  ;;  %p1079_p4 = por %p56_p2, %p55_p1 }
  0x13   : > { %s43_s26 = ssub.s32 %s998_s19, %s1378_s23  ;;  %p139_p6 = scmp.eq.s32.totalorder %s1067_s21, 1 }
  0x14   : > { %p46_p7 = scmp.eq.s32.totalorder %s43_s26, 0  ;;  %p1087_p8 = por %p62_p5, %p61_p3 }
  0x15   : > { %p1091_p9 = por %p139_p6, %p55_p1  ;;  %p145_p10 = scmp.eq.s32.totalorder %s673_s22, 1 }
  0x16   : > { %s1353_s27 = scalar_select %p1087_p8, 1, 0 }
  0x17   : > { %s1354_s28 = scalar_select %p1091_p9, 1, 0 }
  0x18   : > { %s1096_s29 = scalar_select %p46_p7, %s990_s17, %s48_s24  }
  0x19   : > { %p1098_p11 = por %p145_p10, %p61_p3  ;;  %p738_p13 = scmp.lt.s32.totalorder %s1002_s20, 2 }
  0x1a   : > { %1355 = sst [smem:[#allocation18_spill]] %s1096_s29  ;;  %s1340_s5 = sand.u32 1, %s990_s17  }
  0x1b   : > { %s1356_s30 = scalar_select %p1098_p11, 1, 0 }
  0x1c   : > { %s1107_s6 = sshll.u32 %s1340_s5, 3  ;;  %s1110_s7 = sshll.u32 %s998_s19, 7 }
  0x1d   : > { %p1114_p0 = pnand %p738_p13, %p1079_p4  ;;  %s212_s9 = sand.u32 1, %s1002_s20  }
  0x1e   : > { %s1358_s1 = sld [smem:[#allocation19_spill]]  ;;  %s216_s13 = scalar_lea.vmem [#allocation5], %s1107_s6 }
  0x1f   : > { %s1357_s8 = scalar_select %p1114_p0, 1, 0 }
  0x20   : > { %s223_s14 = sshll.u32 %s216_s13, 4  ;;  %s1130_s22 = scalar_lea.sflag [#allocation6], %s212_s9  ;;  %s1127_s14 = int_to_ptr.vmem [resolvable:$true] %s223_s14 }
  0x21   : > { %p1136_p4 = pneg %p1114_p0 }
  0x24   : > { %s1123_s12 = scalar_lea.hbm %s1358_s1, %s1110_s7  ;;  %s799_s11 = scalar_lea.hbm %s1358_s1, 256 }
  0x25   : > { %s794_s24 = scalar_lea.hbm %s1123_s12, 128  ;;  %p800_p7 = scmp.lt.u32.totalorder %s1123_s12, %s1358_s1 }
  0x26   : > { %p795_p3 = scmp.ne.s32.totalorder %s1123_s12, %s794_s24  ;;  %p801_p10 = scmp.lt.u32.totalorder %s799_s11, %s794_s24 }
  0x27   : > { %p803_p12 = scmp.lt.u32.totalorder %s794_s24, %s1123_s12 }
  0x28   : > { %p797_p5 = pnand %p1136_p4, %p795_p3  ;;  %p802_p13 = por %p801_p10, %p800_p7 }
  0x2a   : > { %p798_p6 = pneg %p797_p5  ;;  %p804_p1 = por %p803_p12, %p802_p13 }
  0x2c   : > { %p805_p2 = pnand %p804_p1, %p798_p6 }
  0x2e   : > { %808 = shalt.err (!%p805_p2)
}
  0x2f   : > { %s809_s9 = scalar_lea.vmem %s1127_s14, 128  ;;  %s1004_s26 = smov [#allocation5]  }
  0x30   : > { %p810_p3 = scmp.ne.s32.totalorder %s1127_s14, %s809_s9  ;;  %s814_s10 = sshll.u32 %s1004_s26, 4  ;;  %s815_s10 = int_to_ptr.vmem [resolvable:$false] %s814_s10 }
  0x31   : > { %s816_s5 = scalar_lea.vmem %s815_s10, 256  ;;  %p817_p9 = scmp.lt.s32.totalorder %s1127_s14, %s815_s10 }
  0x32   : > { %p812_p5 = pnand %p810_p3, %p1136_p4  ;;  %p818_p8 = scmp.lt.s32.totalorder %s816_s5, %s809_s9 }
  0x34   : > { %p813_p11 = pneg %p812_p5  ;;  %p819_p7 = por %p818_p8, %p817_p9 }
  0x36   : > { %p820_p10 = pnand %p819_p7, %p813_p11 }
  0x38   : > { %823 = shalt.err (!%p820_p10)
}
  0x39   : > { %727 = dma.hbm_to_vmem [thread:$0]  (!%p1114_p0), %s1123_s12, 128, %s1127_s14, %s1130_s22  }
  0x3a   : > { %p1360_p12 = scmp.lt.s32.totalorder %s1002_s20, 3  ;;  %p1361_p1 = scmp.ge.s32.totalorder %s1002_s20, 1 }
  0x3b   : > { %s1172_s9 = scalar_lea.hbm %s1335_s0, %s1110_s7  ;;  %s197_s26 = scalar_lea.vmem [#allocation2], %s1107_s6 }
  0x3c   : > { %p1164_p2 = pnand %p1361_p1, %p1360_p12  ;;  %s205_s10 = sshll.u32 %s197_s26, 4  ;;  %s1175_s10 = int_to_ptr.vmem [resolvable:$true] %s205_s10 }
  0x3d   : > { %s1181_s5 = scalar_lea.hbm %s1337_s2, %s1110_s7  ;;  %s1363_s1 = sand.u32 1, %s990_s17  }
  0x3e   : > { %s1362_s24 = scalar_select %p1164_p2, 1, 0 }
  0x3f   : > { %s194_s23 = scalar_lea.sflag [#allocation3], %s1363_s1  ;;  %s824_s19 = scalar_lea.hbm %s1172_s9, 128 }
  0x40   : > { %p825_p8 = scmp.ne.s32.totalorder %s1172_s9, %s824_s19  ;;  %s829_s29 = scalar_lea.hbm %s1335_s0, 256 }
  0x41   : > { %p830_p6 = scmp.lt.u32.totalorder %s1172_s9, %s1335_s0  ;;  %p831_p13 = scmp.lt.u32.totalorder %s829_s29, %s824_s19 }
  0x42   : > { %p827_p9 = pnand %p825_p8, %p1136_p4  ;;  %p833_p5 = scmp.lt.u32.totalorder %s824_s19, %s1172_s9 }
  0x43   : > { %p832_p3 = por %p831_p13, %p830_p6 }
  0x44   : > { %p828_p11 = pneg %p827_p9 }
  0x45   : > { %p834_p7 = por %p833_p5, %p832_p3 }
  0x47   : > { %p835_p10 = pnand %p834_p7, %p828_p11 }
  0x49   : > { %838 = shalt.err (!%p835_p10)
}
  0x4a   : > { %s839_s1 = scalar_lea.vmem %s1175_s10, 128  ;;  %s1005_s7 = smov [#allocation2]  }
  0x4b   : > { %p840_p12 = scmp.ne.s32.totalorder %s1175_s10, %s839_s1  ;;  %s844_s12 = sshll.u32 %s1005_s7, 4  ;;  %s845_s12 = int_to_ptr.vmem [resolvable:$false] %s844_s12 }
  0x4c   : > { %s846_s20 = scalar_lea.vmem %s845_s12, 256  ;;  %p847_p9 = scmp.lt.s32.totalorder %s1175_s10, %s845_s12 }
  0x4d   : > { %p842_p1 = pnand %p840_p12, %p1136_p4  ;;  %p848_p2 = scmp.lt.s32.totalorder %s846_s20, %s839_s1 }
  0x4f   : > { %p843_p8 = pneg %p842_p1  ;;  %p849_p6 = por %p848_p2, %p847_p9 }
  0x51   : > { %p850_p13 = pnand %p849_p6, %p843_p8 }
  0x53   : > { %853 = shalt.err (!%p850_p13)
}
  0x54   : > { %724 = dma.hbm_to_vmem [thread:$0]  (!%p1114_p0), %s1172_s9, 128, %s1175_s10, %s194_s23  }
  0x55   : > { %s234_s19 = scalar_lea.vmem [#allocation7], %s1107_s6  ;;  %s854_s14 = scalar_lea.hbm %s1181_s5, 128 }
  0x56   : > { %s241_s29 = sshll.u32 %s234_s19, 4  ;;  %p855_p11 = scmp.ne.s32.totalorder %s1181_s5, %s854_s14  ;;  %s242_s29 = int_to_ptr.vmem [resolvable:$true] %s241_s29 }
  0x57   : > { %s859_s26 = scalar_lea.hbm %s1337_s2, 256  ;;  %p860_p5 = scmp.lt.u32.totalorder %s1181_s5, %s1337_s2 }
  0x58   : > { %p857_p2 = pnand %p855_p11, %p1136_p4  ;;  %p861_p7 = scmp.lt.u32.totalorder %s859_s26, %s854_s14 }
  0x59   : > { %p863_p12 = scmp.lt.u32.totalorder %s854_s14, %s1181_s5 }
  0x5a   : > { %p858_p3 = pneg %p857_p2  ;;  %p862_p10 = por %p861_p7, %p860_p5 }
  0x5c   : > { %p864_p1 = por %p863_p12, %p862_p10 }
  0x5e   : > { %p865_p8 = pnand %p864_p1, %p858_p3 }
  0x60   : > { %868 = shalt.err (!%p865_p8)
}
  0x61   : > { %s869_s23 = scalar_lea.vmem %s242_s29, 128  ;;  %s1006_s6 = smov [#allocation7]  }
  0x62   : > { %p870_p9 = scmp.ne.s32.totalorder %s242_s29, %s869_s23  ;;  %s874_s9 = sshll.u32 %s1006_s6, 4  ;;  %s875_s9 = int_to_ptr.vmem [resolvable:$false] %s874_s9 }
  0x63   : > { %s876_s10 = scalar_lea.vmem %s875_s9, 256  ;;  %p877_p11 = scmp.lt.s32.totalorder %s242_s29, %s875_s9 }
  0x64   : > { %p872_p6 = pnand %p870_p9, %p1136_p4  ;;  %p878_p2 = scmp.lt.s32.totalorder %s876_s10, %s869_s23 }
  0x66   : > { %p873_p13 = pneg %p872_p6  ;;  %p879_p0 = por %p878_p2, %p877_p11 }
  0x68   : > { %p880_p5 = pnand %p879_p0, %p873_p13 }
  0x6a   : > { %883 = shalt.err (!%p880_p5)
}
  0x6b   : > { %p1364_p7 = scmp.ne.s32.totalorder %s1357_s8, 0  ;;  %p1365_p3 = scmp.ne.s32.totalorder %s1362_s24, 0 }
  0x6c   : > { %s1228_s25 = sand.u32 (!%p1365_p3), 1, %s986_s16   ;;  %p1366_p0 = scmp.ne.s32.totalorder (!%p1365_p3), %s1353_s27, 0 }
  0x6d   : > { %730 = dma.hbm_to_vmem [thread:$0]  (!%p1364_p7), %s1181_s5, 128, %s242_s29, %s1130_s22  }
  0x6e   : > { %250 = sbr.rel (%p1365_p3) target bundleno = 879 (0x36f), region = 32  ;;  %s1231_s12 = sshll.u32 (!%p1365_p3), %s1228_s25, 3 }
  0x6f   : > { %s253_s20 = scalar_lea.sflag (!%p1365_p3), [#allocation3], %s1228_s25  ;;  %s256_s19 = scalar_lea.vmem (!%p1365_p3), [#allocation2], %s1231_s12 }
  0x75   : > { %965 = dma.done.wait (%p1366_p0), %s253_s20, 128  }
  0x76   : > { %967 = vsyncadd (%p1366_p0), %s253_s20, 4294967168  ;;  %s261_s8 = sand.u32 1, %s1067_s21   ;;  %s265_s24 = scalar_lea.vmem [#allocation5], %s1231_s12 }
  0x77   : > { %s262_s22 = scalar_lea.sflag [#allocation6], %s261_s8 }
  0x78   : > { %969 = dma.done.wait (%p1366_p0), %s262_s22, 256  }
  0x79   : > { %971 = vsyncadd (%p1366_p0), %s262_s22, 4294967040  ;;  %v1007_v0 = vmov 0.0   ;;  %vm1008_vm0 = vmmov 0   ;;  %vm318_vm1 = vcmask 261120   ;;  %v315_v1 = vld [vmem:[%s265_s24] sm:$0xff]  ;;  %v314_v2 = vld [vmem:[%s256_s19] sm:$0xff] }
  0x7a   : > { %701 = vmatprep.subr.mxu0 %v1007_v0  ;;  %703 = vmatprep.mubr.msk.f32.mxu0 %vm1008_vm0, %v1007_v0  ;;  %v317_v3 = vmul.f32 0.17677669, %v314_v2  ;;  %vm395_vm2 = vcmask 64512   ;;  %s274_s21 = scalar_lea.vmem [#allocation7], %s1231_s12  ;;  %s313_s27 = scalar_lea.vmem [#allocation9], %s1231_s12 }
  0x7b   : > { %706 = vmatprep.subr.mxu1 %v1007_v0  ;;  %708 = vmatprep.mubr.msk.f32.mxu1 %vm1008_vm0, %v1007_v0  ;;  %v316_v12 = vld [vmem:[%s274_s21] sm:$0xff]  ;;  %s693_s5 = sshll.u32 %s994_s18, 7  ;;  %s516_s13 = sshll.u32 %s313_s27, 4  ;;  %s517_s13 = int_to_ptr.vmem [resolvable:$true] %s516_s13 }
  0x7c   : > { %702 = vmatpush3.xpose.msk.msra.mxu0 %vm318_vm1, %v315_v1  ;;  %707 = vmatpush3.msra.mxu1 %v316_v12  ;;  %s1259_s11 = scalar_lea.hbm %s1339_s4, %s693_s5  ;;  %s488_s26 = scalar_lea.sflag [#allocation10], %s1228_s25 }
  0x7d   : > { %s884_s1 = scalar_lea.vmem %s517_s13, 128  ;;  %p1367_p10 = scmp.ne.s32.totalorder %s1354_s28, 0 }
  0x7e   : > { %p885_p4 = scmp.ne.s32.totalorder %s517_s13, %s884_s1  ;;  %s1009_s7 = smov [#allocation9]  }
  0x7f   : > { %704 = vmatmul.mubr.msk.f32.vlgmr.msra.gmra.mrb[0].mxu0 %vm318_vm1, %v317_v3  ;;  %s888_s23 = sshll.u32 %s1009_s7, 4  ;;  %s889_s23 = int_to_ptr.vmem [resolvable:$false] %s888_s23 }
  0x80   : > { %p886_p12 = pnand %p885_p4, %p1367_p10  ;;  %s890_s6 = scalar_lea.vmem %s889_s23, 256 }
  0x81   : > { %p891_p8 = scmp.lt.s32.totalorder %s517_s13, %s889_s23  ;;  %p892_p9 = scmp.lt.s32.totalorder %s890_s6, %s884_s1 }
  0x82   : > { %p887_p1 = pneg %p886_p12 }
  0x83   : > { %p893_p6 = por %p892_p9, %p891_p8 }
  0x85   : > { %p894_p13 = pnand %p893_p6, %p887_p1 }
 0x152   : > { %v391_v4 = vpop.f32.mrb[0].mxu0 }
 0x153   : > { %v705_v5 = vpop.f32.mrb[1].mxu0  ;;  %v396_v6 = vsel %vm395_vm2, %v391_v4, -inf }
 0x154   : > { %397 = vmax.xlane.f32.xlu0 %v396_v6 }
 0x1e1   : > { %v398_v7 = vpop.xlane.xlu0 %397 }
 0x1e2   : > { %v399_v8 = vsub.f32 %v391_v4, %v398_v7 }
 0x1e4   : > { %v400_v9 = vmul.f32 1.442695, %v399_v8 }
 0x1e6   : > { %790 = vpow2.f32 %v400_v9 }
 0x1f0   : > { %v791_v10 = vpop.eup %790 }
 0x1f1   : > { %v402_v11 = vsel %vm395_vm2, %v791_v10, 0.0 }
 0x1f2   : > { %403 = vadd.xlane.f32.xlu0 %v402_v11 }
 0x27f   : > { %v404_v13 = vpop.xlane.xlu0 %403 }
 0x280   : > { %792 = vrcp.f32 %v404_v13 }
 0x28a   : > { %v793_v14 = vpop.eup %792 }
 0x28b   : > { %v406_v15 = vmul.f32 %v793_v14, %v791_v10 }
 0x28d   : > { %709 = vmatmul.mubr.msk.f32.vlgmr.msra.gmra.mrb[0].mxu1 %vm395_vm2, %v406_v15  ;;  %407 = vst.msk [vmem:[%s313_s27] sm:$0xff] %vm395_vm2, %v406_v15 }
 0x28e   : > { %897 = shalt.err (!%p894_p13)
}
 0x28f   : > { %s898_s9 = scalar_lea.hbm %s1259_s11, 128  ;;  %s902_s19 = scalar_lea.hbm %s1339_s4, 256 }
 0x290   : > { %p899_p11 = scmp.ne.s32.totalorder %s1259_s11, %s898_s9  ;;  %p903_p7 = scmp.lt.u32.totalorder %s1259_s11, %s1339_s4 }
 0x291   : > { %p904_p3 = scmp.lt.u32.totalorder %s902_s19, %s898_s9  ;;  %p906_p4 = scmp.lt.u32.totalorder %s898_s9, %s1259_s11 }
 0x292   : > { %p900_p2 = pnand %p899_p11, %p1367_p10 }
 0x293   : > { %p905_p0 = por %p904_p3, %p903_p7 }
 0x294   : > { %p901_p5 = pneg %p900_p2 }
 0x295   : > { %p907_p12 = por %p906_p4, %p905_p0 }
 0x297   : > { %p908_p1 = pnand %p907_p12, %p901_p5 }
 0x299   : > { %911 = shalt.err (!%p908_p1)
}
 0x29a   : > { %718 = dma.vmem_to_hbm [thread:$0]  (%p1367_p10), %s517_s13, 128, %s1259_s11, %s488_s26  }
 0x29b   : > { %s306_s24 = scalar_lea.vmem [#allocation8], %s1231_s12  ;;  %s1285_s14 = scalar_lea.hbm %s1338_s3, %s693_s5 }
 0x29c   : > { %s502_s21 = sshll.u32 %s306_s24, 4  ;;  %s483_s1 = scalar_lea.sflag [#allocation4], %s1228_s25  ;;  %s1287_s21 = int_to_ptr.vmem [resolvable:$true] %s502_s21 }
 0x29d   : > { %s912_s7 = scalar_lea.vmem %s1287_s21, 128  ;;  %s1010_s18 = smov [#allocation8]  }
 0x29e   : > { %p913_p8 = scmp.ne.s32.totalorder %s1287_s21, %s912_s7  ;;  %s916_s12 = sshll.u32 %s1010_s18, 4  ;;  %s917_s12 = int_to_ptr.vmem [resolvable:$false] %s916_s12 }
 0x29f   : > { %s918_s5 = scalar_lea.vmem %s917_s12, 256  ;;  %p919_p13 = scmp.lt.s32.totalorder %s1287_s21, %s917_s12 }
 0x2a0   : > { %p914_p9 = pnand %p913_p8, %p1367_p10  ;;  %p920_p11 = scmp.lt.s32.totalorder %s918_s5, %s912_s7 }
 0x2a2   : > { %p915_p6 = pneg %p914_p9  ;;  %p921_p2 = por %p920_p11, %p919_p13 }
 0x2a4   : > { %p922_p5 = pnand %p921_p2, %p915_p6 }
 0x360   : > { %v477_v16 = vpop.f32.mrb[0].mxu1 }
 0x361   : > { %481 = vst.msk [vmem:[%s306_s24] sm:$0xff] %vm318_vm1, %v477_v16  ;;  %v710_v17 = vpop.f32.mrb[1].mxu1 }
 0x362   : > { %925 = shalt.err (!%p922_p5)
}
 0x363   : > { %s926_s25 = scalar_lea.hbm %s1285_s14, 128  ;;  %s930_s26 = scalar_lea.hbm %s1338_s3, 256 }
 0x364   : > { %p927_p7 = scmp.ne.s32.totalorder %s1285_s14, %s926_s25  ;;  %p931_p4 = scmp.lt.u32.totalorder %s1285_s14, %s1338_s3 }
 0x365   : > { %p932_p12 = scmp.lt.u32.totalorder %s930_s26, %s926_s25  ;;  %p934_p8 = scmp.lt.u32.totalorder %s926_s25, %s1285_s14 }
 0x366   : > { %p928_p3 = pnand %p927_p7, %p1367_p10 }
 0x367   : > { %p933_p1 = por %p932_p12, %p931_p4 }
 0x368   : > { %p929_p0 = pneg %p928_p3 }
 0x369   : > { %p935_p9 = por %p934_p8, %p933_p1 }
 0x36b   : > { %p936_p6 = pnand %p935_p9, %p929_p0 }
 0x36d   : > { %939 = shalt.err (!%p936_p6)
}
 0x36e   : > { %717 = dma.vmem_to_hbm [thread:$0]  (%p1367_p10), %s1287_s21, 128, %s1285_s14, %s483_s1  }
 0x36f PF: > { %s1368_s9 = sld [smem:[#allocation16_spill]]  ;;  %s528_s10 = sand.u32 1, %s982_s15  }
 0x370   : > { %p1369_p13 = scmp.ne.s32.totalorder %s1356_s30, 0  ;;  %s529_s20 = scalar_lea.sflag [#allocation4], %s528_s10 }
 0x375   : > { %p1370_p11 = scmp.ge.s32.totalorder %s1368_s9, 2 }
 0x377   : > { %p732_p2 = pnand %p1370_p11, %p1369_p13 }
 0x379   : > { %973 = dma.done.wait (!%p732_p2), %s529_s20, 128  }
 0x37a   : > { %975 = vsyncadd (!%p732_p2), %s529_s20, 4294967168  ;;  %s538_s19 = scalar_lea.sflag [#allocation10], %s528_s10 }
 0x37b   : > { %977 = dma.done.wait (!%p732_p2), %s538_s19, 128  }
 0x37c   : > { %979 = vsyncadd (!%p732_p2), %s538_s19, 4294967168  ;;  %s27_s20 = sadd.s32 1, %s1368_s9   ;;  %s1371_s28 = sld [smem:[#allocation18_spill]] }
 0x37d   : > { %p24_p5 = scmp.ge.s32.totalorder %s27_s20, 4   ;;  %s1372_s18 = sld [smem:[#allocation15_spill]] }
 0x37e   : > { %s1373_s19 = sld [smem:[#allocation17_spill]]  ;;  %s1374_s15 = smov %s986_s16 }
 0x37f   : > { %s1375_s16 = smov %s990_s17  ;;  %26 = sbr.rel (!%p24_p5) target bundleno = 12 (0xc), region = 118 }
 0x382   : > { %s1376_s17 = smov %s1371_s28 }
 0x386   :  { %543 = vsyncpa [#allocation3], 1 }
 0x387   :  { %545 = vsyncpa [#allocation3 + $0x1], 1 }
 0x388   :  { %546 = vsyncpa [#allocation6], 1 }
 0x389   :  { %548 = vsyncpa [#allocation6 + $0x1], 1 }
 0x38a   :  { %549 = vsyncpa [#allocation4], 1 }
 0x38b   :  { %551 = vsyncpa [#allocation4 + $0x1], 1 }
 0x38c   :  { %552 = vsyncpa [#allocation10], 1 }
 0x38d   :  { %554 = vsyncpa [#allocation10 + $0x1], 1 }

</bundles_post_ra>
